<compile_context>
chip_gen: v7x
topology: tpu7x:2x2x1
jax: 0.10.0
libtpu: 0.0.40
codegen_flags: <defaults>
</compile_context>

<pallas_src>
import functools

import jax
import jax.numpy as jnp
from jax.experimental import pallas as pl
from jax.experimental.pallas import tpu as pltpu


# ----------------------------- helpers --------------------------------------


def _round_up(n: int, m: int) -> int:
    return ((n + m - 1) // m) * m


def _pad2d(a, rows: int, cols: int):
    return jnp.pad(a, ((0, rows - a.shape[0]), (0, cols - a.shape[1])))


def _choose_tm(m: int) -> int:
    # 256-aligned tiles fill the v6e/v7x MXU; 128 for mid sizes; tiny batches
    # just round up to the 8-sublane granule (single grid step).
    if m >= 256:
        return 256
    if m >= 128:
        return 128
    return _round_up(m, 8)


# ----------------------------- kernel ---------------------------------------


def _expert_kernel(*refs, num_layers: int, n_pads):
    """Fused MLP: per layer  y = act(x @ (W*scale) + shift).

    refs = (x_ref, w_0, ..., w_{L-1}, shifts_ref, o_ref)
      x_ref      : (tm, K0_pad)         bf16
      w_i        : (Ki_pad, Ni_pad)     bf16   (W^T with BN scale folded in)
      shifts_ref : (L, N_max_pad)       f32    row i = folded bias/BN shift
      o_ref      : (tm, N_last_pad)     f32
    Intermediate activations never leave VMEM / vregs.
    """
    x_ref = refs[0]
    w_refs = refs[1:1 + num_layers]
    sh_ref = refs[1 + num_layers]
    o_ref = refs[-1]

    y = x_ref[...]  # bf16
    for i in range(num_layers):
        w_ref = w_refs[i]
        n_pad = n_pads[i]
        # MXU matmul in bf16 with f32 accumulation.
        z = jnp.dot(y, w_ref[...], preferred_element_type=jnp.float32)
        # Folded (bias + eval-mode BN beta/mean) shift, f32 on the VPU.
        z = z + sh_ref[i:i + 1, 0:n_pad]
        if i != num_layers - 1:
            z = jnp.where(z >= 0.0, z, 0.01 * z)   # LeakyReLU(0.01)
            y = z.astype(jnp.bfloat16)             # back to MXU dtype
        else:
            y = z
        # TODO(synk): training-mode Dropout / BN batch statistics are not
        # implemented (identity in eval mode).
    o_ref[...] = y


def expert_forward(x, padded_params, out_features: int):
    """Run the fused expert. Returns [batch, out_features] f32."""
    M, _ = x.shape
    weights = padded_params["weights"]      # list of bf16 (k_pad, n_pad)
    shifts = padded_params["shifts"]        # (L, n_max_pad) f32
    n_pads = padded_params["n_pads"]        # static tuple of padded widths

    k_pad0 = weights[0].shape[0]
    n_out_pad = weights[-1].shape[1]

    tm = _choose_tm(M)
    m_pad = _round_up(M, tm)
    x_pad = _pad2d(x, m_pad, k_pad0).astype(jnp.bfloat16)

    in_specs = [pl.BlockSpec((tm, k_pad0), lambda i: (i, 0))]
    args = [x_pad]
    for w in weights:
        # Constant block index across the batch grid -> weights stay resident.
        in_specs.append(pl.BlockSpec(w.shape, lambda i: (0, 0)))
        args.append(w)
    in_specs.append(pl.BlockSpec(shifts.shape, lambda i: (0, 0)))
    args.append(shifts)

    kernel = functools.partial(
        _expert_kernel, num_layers=len(weights), n_pads=n_pads)
    out = pl.pallas_call(
        kernel,
        out_shape=jax.ShapeDtypeStruct((m_pad, n_out_pad), jnp.float32),
        grid=(m_pad // tm,),
        in_specs=in_specs,
        out_specs=pl.BlockSpec((tm, n_out_pad), lambda i: (i, 0)),
        compiler_params=pltpu.CompilerParams(
            dimension_semantics=("parallel",)),
    )(*args)
    return out[:M, :out_features]


# ----------------------------- params ---------------------------------------


def init_expert_params(key, input_size, hidden_sizes):
    """nn.Linear default init (U(-1/sqrt(fan_in), +1/sqrt(fan_in))) plus fresh
    BatchNorm1d (gamma=1, beta=0, mean=0, var=1), with:
      * eval-mode BN scale folded into the (transposed, bf16) weight,
      * linear bias + BN shift folded into a single f32 shift vector,
      * features zero-padded to multiples of 128,
      * all per-layer shifts packed into one (L, N_max_pad) array.
    Returns (raw_params for the f32 reference, padded_params for the kernel)."""
    sizes = [input_size] + list(hidden_sizes)
    eps = 1e-5
    raw_params = []
    weights, shift_rows, n_pads = [], [], []
    for i in range(len(sizes) - 1):
        fan_in, fan_out = sizes[i], sizes[i + 1]
        key, kw, kb = jax.random.split(key, 3)
        bound = 1.0 / jnp.sqrt(fan_in)
        w = jax.random.uniform(kw, (fan_out, fan_in), jnp.float32, -bound, bound)
        b = jax.random.uniform(kb, (fan_out,), jnp.float32, -bound, bound)

        is_last = i == len(sizes) - 2
        if is_last:
            scale = jnp.ones((fan_out,), jnp.float32)
            bn_shift = jnp.zeros((fan_out,), jnp.float32)
        else:
            gamma = jnp.ones((fan_out,), jnp.float32)
            beta = jnp.zeros((fan_out,), jnp.float32)
            running_mean = jnp.zeros((fan_out,), jnp.float32)
            running_var = jnp.ones((fan_out,), jnp.float32)
            scale = gamma / jnp.sqrt(running_var + eps)
            bn_shift = beta - running_mean * scale
        # (xW + b)*s + t  =  x(W*s) + (b*s + t)
        shift = b * scale + bn_shift
        w_scaled_t = w.T * scale[None, :]           # [in, out], scale folded

        raw_params.append({
            "w_t": w.T,                             # [in, out], f32 (unfolded)
            "scale": scale.reshape(1, fan_out),
            "shift": shift.reshape(1, fan_out),
            "apply_act": not is_last,
        })

        k_pad = _round_up(fan_in, 128)
        n_pad = _round_up(fan_out, 128)
        weights.append(_pad2d(w_scaled_t, k_pad, n_pad).astype(jnp.bfloat16))
        shift_rows.append(jnp.pad(shift, (0, n_pad - fan_out)))
        n_pads.append(n_pad)

    n_max_pad = max(n_pads)
    shifts = jnp.stack(
        [jnp.pad(s, (0, n_max_pad - s.shape[0])) for s in shift_rows]
    ).astype(jnp.float32)                            # (L, n_max_pad)

    padded_params = {
        "weights": weights,
        "shifts": shifts,
        "n_pads": tuple(n_pads),
    }
    return raw_params, padded_params


# ----------------------------- references -----------------------------------


def expert_reference_f32(x, raw_params):
    """Pure-JAX f32 reference (PyTorch-equivalent eval-mode math, no padding)."""
    for layer in raw_params:
        y = x @ layer["w_t"]
        y = y * layer["scale"] + layer["shift"]
        if layer["apply_act"]:
            y = jnp.where(y >= 0.0, y, 0.01 * y)
        x = y
    return x


def expert_reference_bf16(x, padded_params, out_features: int):
    """Pure-JAX reference doing the exact padded bf16/f32 math the kernel does."""
    weights = padded_params["weights"]
    shifts = padded_params["shifts"]
    n_pads = padded_params["n_pads"]
    k_pad0 = weights[0].shape[0]
    y = _pad2d(x, x.shape[0], k_pad0).astype(jnp.bfloat16)
    L = len(weights)
    for i, w in enumerate(weights):
        z = jnp.dot(y, w, preferred_element_type=jnp.float32)
        z = z + shifts[i:i + 1, :n_pads[i]]
        if i != L - 1:
            z = jnp.where(z >= 0.0, z, 0.01 * z)
            y = z.astype(jnp.bfloat16)
        else:
            y = z
    return y[:, :out_features]


# ----------------------------- main ------------------------------------------


if __name__ == "__main__":
    key = jax.random.PRNGKey(0)
    k_x, k_p = jax.random.split(key)

    batch = 8
    input_size = 32
    hidden_sizes = [64, 48, 16]

    x = jax.random.normal(k_x, (batch, input_size), jnp.float32)
    raw_params, padded_params = init_expert_params(k_p, input_size, hidden_sizes)

    out = expert_forward(x, padded_params, hidden_sizes[-1])
    out = jax.block_until_ready(out)
    assert out.shape == (batch, hidden_sizes[-1]), out.shape

    # Tight check against a JAX reference doing the identical bf16/f32 math.
    ref_bf16 = expert_reference_bf16(x, padded_params, hidden_sizes[-1])
    assert jnp.allclose(out, ref_bf16, atol=1e-4, rtol=1e-4), "mismatch vs bf16 ref"

    # Looser semantic check against full-f32 PyTorch-equivalent math.
    ref_f32 = expert_reference_f32(x, raw_params)
    assert jnp.allclose(out, ref_f32, atol=5e-2, rtol=5e-2), "mismatch vs f32 ref"

    print("KERNEL_OK")
</pallas_src>

<mosaic_0001>
module attributes {stable_mosaic.version = 11 : i64} {
  func.func @_expert_kernel(%arg0: i32, %arg1: memref<8x128xbf16, #tpu.memory_space<vmem>>, %arg2: memref<128x128xbf16, #tpu.memory_space<vmem>>, %arg3: memref<128x128xbf16, #tpu.memory_space<vmem>>, %arg4: memref<128x128xbf16, #tpu.memory_space<vmem>>, %arg5: memref<3x128xf32, #tpu.memory_space<vmem>>, %arg6: memref<8x128xf32, #tpu.memory_space<vmem>>) attributes {dimension_semantics = [#tpu.dimension_semantics<parallel>], iteration_bounds = array<i64: 1>, scalar_prefetch = 0 : i64, scratch_operands = 0 : i64, tpu.core_type = #tpu.core_type<tc>, window_params = [{transform_indices = @transform_0, window_bounds = array<i64: 8, 128>}, {pipeline_mode = #tpu.pipeline_mode<synchronous>, transform_indices = @transform_1, window_bounds = array<i64: 128, 128>}, {pipeline_mode = #tpu.pipeline_mode<synchronous>, transform_indices = @transform_2, window_bounds = array<i64: 128, 128>}, {pipeline_mode = #tpu.pipeline_mode<synchronous>, transform_indices = @transform_3, window_bounds = array<i64: 128, 128>}, {pipeline_mode = #tpu.pipeline_mode<synchronous>, transform_indices = @transform_4, window_bounds = array<i64: 3, 128>}, {transform_indices = @transform_5, window_bounds = array<i64: 8, 128>}]} {
    %c0 = arith.constant 0 : index
    %c0_0 = arith.constant 0 : index
    %0 = vector.load %arg1[%c0, %c0_0] : memref<8x128xbf16, #tpu.memory_space<vmem>>, vector<8x128xbf16>
    %c0_1 = arith.constant 0 : index
    %c0_2 = arith.constant 0 : index
    %1 = vector.load %arg2[%c0_1, %c0_2] : memref<128x128xbf16, #tpu.memory_space<vmem>>, vector<128x128xbf16>
    %cst = arith.constant dense<0.000000e+00> : vector<8x128xf32>
    %2 = tpu.matmul %0, %1, %cst {dimension_numbers = #tpu.dot_dimension_numbers<[1], [0], [0], [1], [0, 0, 1, 1], [], []>} : vector<8x128xbf16>, vector<128x128xbf16>, vector<8x128xf32> -> vector<8x128xf32>
    %c0_3 = arith.constant 0 : index
    %c0_4 = arith.constant 0 : index
    %3 = vector.load %arg5[%c0_3, %c0_4] : memref<3x128xf32, #tpu.memory_space<vmem>>, vector<1x128xf32>
    %4 = vector.broadcast %3 : vector<1x128xf32> to vector<8x128xf32>
    %5 = arith.addf %2, %4 : vector<8x128xf32>
    %cst_5 = arith.constant 0.000000e+00 : f32
    %6 = vector.broadcast %cst_5 : f32 to vector<8x128xf32>
    %7 = arith.cmpf oge, %5, %6 : vector<8x128xf32>
    %cst_6 = arith.constant 0.00999999977 : f32
    %8 = vector.broadcast %cst_6 : f32 to vector<8x128xf32>
    %9 = arith.mulf %8, %5 : vector<8x128xf32>
    %10 = arith.select %7, %5, %9 : vector<8x128xi1>, vector<8x128xf32>
    %11 = arith.truncf %10 : vector<8x128xf32> to vector<8x128xbf16>
    %c0_7 = arith.constant 0 : index
    %c0_8 = arith.constant 0 : index
    %12 = vector.load %arg3[%c0_7, %c0_8] : memref<128x128xbf16, #tpu.memory_space<vmem>>, vector<128x128xbf16>
    %cst_9 = arith.constant dense<0.000000e+00> : vector<8x128xf32>
    %13 = tpu.matmul %11, %12, %cst_9 {dimension_numbers = #tpu.dot_dimension_numbers<[1], [0], [0], [1], [0, 0, 1, 1], [], []>} : vector<8x128xbf16>, vector<128x128xbf16>, vector<8x128xf32> -> vector<8x128xf32>
    %c1 = arith.constant 1 : index
    %c0_10 = arith.constant 0 : index
    %14 = vector.load %arg5[%c1, %c0_10] : memref<3x128xf32, #tpu.memory_space<vmem>>, vector<1x128xf32>
    %15 = vector.broadcast %14 : vector<1x128xf32> to vector<8x128xf32>
    %16 = arith.addf %13, %15 : vector<8x128xf32>
    %cst_11 = arith.constant 0.000000e+00 : f32
    %17 = vector.broadcast %cst_11 : f32 to vector<8x128xf32>
    %18 = arith.cmpf oge, %16, %17 : vector<8x128xf32>
    %cst_12 = arith.constant 0.00999999977 : f32
    %19 = vector.broadcast %cst_12 : f32 to vector<8x128xf32>
    %20 = arith.mulf %19, %16 : vector<8x128xf32>
    %21 = arith.select %18, %16, %20 : vector<8x128xi1>, vector<8x128xf32>
    %22 = arith.truncf %21 : vector<8x128xf32> to vector<8x128xbf16>
    %c0_13 = arith.constant 0 : index
    %c0_14 = arith.constant 0 : index
    %23 = vector.load %arg4[%c0_13, %c0_14] : memref<128x128xbf16, #tpu.memory_space<vmem>>, vector<128x128xbf16>
    %cst_15 = arith.constant dense<0.000000e+00> : vector<8x128xf32>
    %24 = tpu.matmul %22, %23, %cst_15 {dimension_numbers = #tpu.dot_dimension_numbers<[1], [0], [0], [1], [0, 0, 1, 1], [], []>} : vector<8x128xbf16>, vector<128x128xbf16>, vector<8x128xf32> -> vector<8x128xf32>
    %c2 = arith.constant 2 : index
    %c0_16 = arith.constant 0 : index
    %25 = vector.load %arg5[%c2, %c0_16] : memref<3x128xf32, #tpu.memory_space<vmem>>, vector<1x128xf32>
    %26 = vector.broadcast %25 : vector<1x128xf32> to vector<8x128xf32>
    %27 = arith.addf %24, %26 : vector<8x128xf32>
    %c0_17 = arith.constant 0 : index
    %c0_18 = arith.constant 0 : index
    %28 = vector.load %arg6[%c0_17, %c0_18] : memref<8x128xf32, #tpu.memory_space<vmem>>, vector<8x128xf32>
    tpu.vector_store %arg6[%c0_17, %c0_18], %27 {strides = array<i32>} : memref<8x128xf32, #tpu.memory_space<vmem>>, vector<8x128xf32>,
    return
  }
  func.func @transform_0(%arg0: i32) -> (i32, i32) {
    %c0_i32 = arith.constant 0 : i32
    %c0_i32_0 = arith.constant 0 : i32
    return %arg0, %c0_i32 : i32, i32
  }
  func.func @transform_1(%arg0: i32) -> (i32, i32) {
    %c0_i32 = arith.constant 0 : i32
    %c0_i32_0 = arith.constant 0 : i32
    %c0_i32_1 = arith.constant 0 : i32
    return %c0_i32, %c0_i32_0 : i32, i32
  }
  func.func @transform_2(%arg0: i32) -> (i32, i32) {
    %c0_i32 = arith.constant 0 : i32
    %c0_i32_0 = arith.constant 0 : i32
    %c0_i32_1 = arith.constant 0 : i32
    return %c0_i32, %c0_i32_0 : i32, i32
  }
  func.func @transform_3(%arg0: i32) -> (i32, i32) {
    %c0_i32 = arith.constant 0 : i32
    %c0_i32_0 = arith.constant 0 : i32
    %c0_i32_1 = arith.constant 0 : i32
    return %c0_i32, %c0_i32_0 : i32, i32
  }
  func.func @transform_4(%arg0: i32) -> (i32, i32) {
    %c0_i32 = arith.constant 0 : i32
    %c0_i32_0 = arith.constant 0 : i32
    %c0_i32_1 = arith.constant 0 : i32
    return %c0_i32, %c0_i32_0 : i32, i32
  }
  func.func @transform_5(%arg0: i32) -> (i32, i32) {
    %c0_i32 = arith.constant 0 : i32
    %c0_i32_0 = arith.constant 0 : i32
    return %arg0, %c0_i32 : i32, i32
  }
}

</mosaic_0001>

<bundles_post_ra>
// kernel: tpu_custom_call.1
= control target key start
LH: loop header
LB: loop body
LE: loop exit
PB: predicated region body
PF: predicated region fallthrough
CT: control target
= control target key end

     0   :  { %10 = vsyncpa [#allocation3], 0  ;;  %s841_s0 = inlined_call_operand.hbm [shape: bf16[8,128], index: 0, kind: input, shape index: {}]   ;;  %s842_s1 = inlined_call_operand.hbm [shape: bf16[128,128], index: 1, kind: input, shape index: {}]   ;;  %s843_s2 = inlined_call_operand.hbm [shape: bf16[128,128], index: 2, kind: input, shape index: {}]   ;;  %s844_s3 = inlined_call_operand.hbm [shape: bf16[128,128], index: 3, kind: input, shape index: {}]   ;;  %s845_s4 = inlined_call_operand.vmem [shape: f32[3,128], index: 4, kind: input, shape index: {}]   ;;  %s846_s5 = inlined_call_operand.hbm [shape: f32[8,128], index: 5, kind: output, shape index: {}]  }
   0x1   :  { %11 = vsyncpa [#allocation6], 0 }
   0x2   :  { %12 = vsyncpa [#allocation9], 0 }
   0x3   :  { %13 = vsyncpa [#allocation4], 0  ;;  %s694_s18 = smov [#allocation5]   ;;  %s576_s22 = scalar_lea.hbm %s842_s1, 1024 }
   0x4   :  { %s29_s19 = sshll.u32 %s694_s18, 4  ;;  %p577_p0 = scmp.ne.s32.totalorder %s842_s1, %s576_s22  ;;  %s30_s19 = int_to_ptr.vmem [resolvable:$true] %s29_s19 }
   0x5   :  { %p580_p1 = scmp.lt.u32.totalorder %s576_s22, %s842_s1 }
   0x7   :  { %p582_p2 = pnand %p580_p1, %p577_p0 }
   0x9   :  { %585 = shalt.err (!%p582_p2)
}
   0xa   :  { %s586_s27 = scalar_lea.vmem %s30_s19, 1024  ;;  %p591_p4 = scmp.lt.s32.totalorder %s30_s19, %s30_s19 }
   0xb   :  { %p587_p3 = scmp.ne.s32.totalorder %s30_s19, %s586_s27  ;;  %p592_p5 = scmp.lt.s32.totalorder %s586_s27, %s586_s27 }
   0xd   :  { %p593_p6 = por %p592_p5, %p591_p4 }
   0xf   :  { %p594_p7 = pnand %p593_p6, %p587_p3 }
  0x11   :  { %597 = shalt.err (!%p594_p7)
}
  0x12   :  { %s695_s28 = smov 64   ;;  %s696_s29 = smov 4  }
  0x13   :  { %35 = dma.hbm_to_vmem [thread:$0]  %s842_s1, 1024, %s30_s19, [#allocation6], %s695_s28, %s695_s28, %s696_s29  }
  0x14   :  { %s697_s7 = smov [#allocation2]   ;;  %s698_s9 = smov [#allocation7]  }
  0x15   :  { %s20_s8 = sshll.u32 %s697_s7, 4  ;;  %s41_s10 = sshll.u32 %s698_s9, 4  ;;  %s21_s8 = int_to_ptr.vmem [resolvable:$true] %s20_s8  ;;  %s42_s10 = int_to_ptr.vmem [resolvable:$true] %s41_s10 }
  0x16   :  { %s598_s13 = scalar_lea.hbm %s841_s0, 64 }
  0x17   :  { %p599_p8 = scmp.ne.s32.totalorder %s841_s0, %s598_s13  ;;  %p602_p9 = scmp.lt.u32.totalorder %s598_s13, %s841_s0 }
  0x19   :  { %p604_p10 = pnand %p602_p9, %p599_p8 }
  0x1b   :  { %607 = shalt.err (!%p604_p10)
}
  0x1c   :  { %s608_s1 = scalar_lea.vmem %s21_s8, 64  ;;  %p613_p12 = scmp.lt.s32.totalorder %s21_s8, %s21_s8 }
  0x1d   :  { %p609_p11 = scmp.ne.s32.totalorder %s21_s8, %s608_s1  ;;  %p614_p13 = scmp.lt.s32.totalorder %s608_s1, %s608_s1 }
  0x1f   :  { %p615_p0 = por %p614_p13, %p613_p12 }
  0x21   :  { %p616_p1 = pnand %p615_p0, %p609_p11 }
  0x23   :  { %619 = shalt.err (!%p616_p1)
}
  0x24   :  { %23 = dma.hbm_to_vmem [thread:$0]  %s841_s0, 64, %s21_s8, [#allocation3]  }
  0x25   :  { %s620_s22 = scalar_lea.hbm %s843_s2, 1024 }
  0x26   :  { %p621_p2 = scmp.ne.s32.totalorder %s843_s2, %s620_s22  ;;  %p624_p3 = scmp.lt.u32.totalorder %s620_s22, %s843_s2 }
  0x28   :  { %p626_p4 = pnand %p624_p3, %p621_p2 }
  0x2a   :  { %629 = shalt.err (!%p626_p4)
}
  0x2b   :  { %s630_s27 = scalar_lea.vmem %s42_s10, 1024  ;;  %p635_p6 = scmp.lt.s32.totalorder %s42_s10, %s42_s10 }
  0x2c   :  { %p631_p5 = scmp.ne.s32.totalorder %s42_s10, %s630_s27  ;;  %p636_p7 = scmp.lt.s32.totalorder %s630_s27, %s630_s27 }
  0x2e   :  { %p637_p8 = por %p636_p7, %p635_p6 }
  0x30   :  { %p638_p9 = pnand %p637_p8, %p631_p5 }
  0x32   :  { %641 = shalt.err (!%p638_p9)
}
  0x33   :  { %47 = dma.hbm_to_vmem [thread:$0]  %s843_s2, 1024, %s42_s10, [#allocation6], %s695_s28, %s695_s28, %s696_s29  }
  0x34   :  { %s699_s6 = smov [#allocation8]   ;;  %s642_s11 = scalar_lea.hbm %s844_s3, 1024 }
  0x35   :  { %s53_s7 = sshll.u32 %s699_s6, 4  ;;  %p643_p10 = scmp.ne.s32.totalorder %s844_s3, %s642_s11  ;;  %s54_s7 = int_to_ptr.vmem [resolvable:$true] %s53_s7 }
  0x36   :  { %p646_p11 = scmp.lt.u32.totalorder %s642_s11, %s844_s3 }
  0x38   :  { %p648_p12 = pnand %p646_p11, %p643_p10 }
  0x3a   :  { %651 = shalt.err (!%p648_p12)
}
  0x3b   :  { %s652_s16 = scalar_lea.vmem %s54_s7, 1024  ;;  %p657_p0 = scmp.lt.s32.totalorder %s54_s7, %s54_s7 }
  0x3c   :  { %p653_p13 = scmp.ne.s32.totalorder %s54_s7, %s652_s16  ;;  %p658_p1 = scmp.lt.s32.totalorder %s652_s16, %s652_s16 }
  0x3e   :  { %p659_p2 = por %p658_p1, %p657_p0 }
  0x40   :  { %p660_p3 = pnand %p659_p2, %p653_p13 }
  0x42   :  { %663 = shalt.err (!%p660_p3)
}
  0x43   :  { %59 = dma.hbm_to_vmem [thread:$0]  %s844_s3, 1024, %s54_s7, [#allocation9], %s695_s28, %s695_s28, %s696_s29  }
  0x44   :  { %686 = dma.done.wait [#allocation3], 64  }
  0x45   :  { %687 = vsyncadd [#allocation3], 4294967232 }
  0x46   :  { %688 = dma.done.wait [#allocation6], 2048  }
  0x47   :  { %689 = vsyncadd [#allocation6], 4294965248 }
  0x48   :  { %690 = dma.done.wait [#allocation9], 1024  }
  0x49   :  { %691 = vsyncadd [#allocation9], 4294966272  ;;  %v700_v0 = vmov 0.0   ;;  %vm701_vm0 = vmmov 0   ;;  %v552_v1 = vld [vmem:[#allocation5] sm:$0xff]   ;;  %v553_v2 = vld [vmem:[#allocation5 + $0x8] sm:$0xff]  }
  0x4a   :  { %483 = vmatprep.subr.bf16.mxu0 %v700_v0  ;;  %499 = vmatprep.mubr.msk.bf16.mxu0 %vm701_vm0, %v700_v0  ;;  %v554_v3 = vld [vmem:[#allocation5 + $0x10] sm:$0xff]   ;;  %v560_v4 = vld [vmem:[#allocation7] sm:$0xff]   ;;  %v555_v5 = vld [vmem:[#allocation5 + $0x18] sm:$0xff]   ;;  %s702_s19 = smov [#allocation10]  }
  0x4b   :  { %503 = vmatprep.subr.bf16.mxu1 %v700_v0  ;;  %519 = vmatprep.mubr.msk.bf16.mxu1 %vm701_vm0, %v700_v0  ;;  %v561_v6 = vld [vmem:[#allocation7 + $0x8] sm:$0xff]   ;;  %v556_v7 = vld [vmem:[#allocation5 + $0x20] sm:$0xff]   ;;  %v562_v8 = vld [vmem:[#allocation7 + $0x10] sm:$0xff]   ;;  %s418_s20 = sshll.u32 %s702_s19, 4  ;;  %s419_s20 = int_to_ptr.vmem [resolvable:$true] %s418_s20 }
  0x4c   :  { %484 = vmatpush3.bf16.msra.mxu0 %v552_v1  ;;  %504 = vmatpush3.bf16.msra.mxu1 %v560_v4  ;;  %v557_v9 = vld [vmem:[#allocation5 + $0x28] sm:$0xff]   ;;  %v563_v10 = vld [vmem:[#allocation7 + $0x18] sm:$0xff]   ;;  %v558_v11 = vld [vmem:[#allocation5 + $0x30] sm:$0xff]   ;;  %s664_s21 = scalar_lea.vmem %s419_s20, 128  ;;  %p669_p5 = scmp.lt.s32.totalorder %s419_s20, %s419_s20 }
  0x4d   :  { %485 = vmatprep.subr.bf16.mxu0 %v700_v0  ;;  %505 = vmatprep.subr.bf16.mxu1 %v700_v0  ;;  %v564_v12 = vld [vmem:[#allocation7 + $0x20] sm:$0xff]   ;;  %v559_v13 = vld [vmem:[#allocation5 + $0x38] sm:$0xff]   ;;  %v565_v14 = vld [vmem:[#allocation7 + $0x28] sm:$0xff]   ;;  %p665_p4 = scmp.ne.s32.totalorder %s419_s20, %s664_s21  ;;  %p670_p6 = scmp.lt.s32.totalorder %s664_s21, %s664_s21 }
  0x4e   :  { %v75_v15 = vld [vmem:[#allocation2] sm:$0xf]  ;;  %v566_v16 = vld [vmem:[#allocation7 + $0x30] sm:$0xff]   ;;  %v568_v18 = vld [vmem:[#allocation8] sm:$0xff]  }
  0x4f   :  { %v567_v17 = vld [vmem:[#allocation7 + $0x38] sm:$0xff]   ;;  %v569_v19 = vld [vmem:[#allocation8 + $0x8] sm:$0xff]   ;;  %v570_v20 = vld [vmem:[#allocation8 + $0x10] sm:$0xff]   ;;  %p671_p7 = por %p670_p6, %p669_p5 }
  0x50   :  { %486 = vmatpush3.bf16.msra.mxu0 %v553_v2  ;;  %506 = vmatpush3.bf16.msra.mxu1 %v561_v6  ;;  %v571_v21 = vld [vmem:[#allocation8 + $0x18] sm:$0xff]   ;;  %v572_v22 = vld [vmem:[#allocation8 + $0x20] sm:$0xff]   ;;  %v573_v23 = vld [vmem:[#allocation8 + $0x28] sm:$0xff]  }
  0x51   :  { %487 = vmatprep.subr.bf16.mxu0 %v700_v0  ;;  %507 = vmatprep.subr.bf16.mxu1 %v700_v0  ;;  %v429_v24 = vld [vmem:[%s845_s4] ss:$0 sm:$0xff]  ;;  %v574_v33 = vld [vmem:[#allocation8 + $0x30] sm:$0xff]   ;;  %v438_v35 = vld [vmem:[%s845_s4 + $0x1] ss:$0 sm:$0xff]  ;;  %p672_p8 = pnand %p671_p7, %p665_p4 }
  0x52   :  { %v575_v34 = vld [vmem:[#allocation8 + $0x38] sm:$0xff]  }
  0x53   :  { %v447_v44 = vld [vmem:[%s845_s4 + $0x2] ss:$0 sm:$0xff] }
  0x54   :  { %488 = vmatpush3.bf16.msra.mxu0 %v554_v3  ;;  %508 = vmatpush3.bf16.msra.mxu1 %v562_v8 }
  0x55   :  { %489 = vmatprep.subr.bf16.mxu0 %v700_v0  ;;  %509 = vmatprep.subr.bf16.mxu1 %v700_v0 }
  0x58   :  { %490 = vmatpush3.bf16.msra.mxu0 %v555_v5  ;;  %510 = vmatpush3.bf16.msra.mxu1 %v563_v10 }
  0x59   :  { %491 = vmatprep.subr.bf16.mxu0 %v700_v0  ;;  %511 = vmatprep.subr.bf16.mxu1 %v700_v0 }
  0x5c   :  { %492 = vmatpush3.bf16.msra.mxu0 %v556_v7  ;;  %512 = vmatpush3.bf16.msra.mxu1 %v564_v12 }
  0x5d   :  { %493 = vmatprep.subr.bf16.mxu0 %v700_v0  ;;  %513 = vmatprep.subr.bf16.mxu1 %v700_v0 }
  0x60   :  { %494 = vmatpush3.bf16.msra.mxu0 %v557_v9  ;;  %514 = vmatpush3.bf16.msra.mxu1 %v565_v14 }
  0x61   :  { %495 = vmatprep.subr.bf16.mxu0 %v700_v0  ;;  %515 = vmatprep.subr.bf16.mxu1 %v700_v0 }
  0x64   :  { %496 = vmatpush3.bf16.msra.mxu0 %v558_v11  ;;  %516 = vmatpush3.bf16.msra.mxu1 %v566_v16 }
  0x65   :  { %497 = vmatprep.subr.bf16.mxu0 %v700_v0  ;;  %517 = vmatprep.subr.bf16.mxu1 %v700_v0 }
  0x68   :  { %498 = vmatpush3.bf16.msra.mxu0 %v559_v13  ;;  %518 = vmatpush3.bf16.msra.mxu1 %v567_v17 }
  0x69   :  { %523 = vmatprep.subr.bf16.mxu0 %v700_v0 }
  0x6b   :  { %500 = vmatmul.mubr.bf16.vlgmr.msra.gmra.mrb[0].mxu0 %v75_v15 }
  0x6c   :  { %539 = vmatprep.mubr.msk.bf16.mxu0 %vm701_vm0, %v700_v0  ;;  %524 = vmatpush3.bf16.msra.mxu0 %v568_v18 }
  0x6d   :  { %525 = vmatprep.subr.bf16.mxu0 %v700_v0 }
  0x70   :  { %526 = vmatpush3.bf16.msra.mxu0 %v569_v19 }
  0x71   :  { %527 = vmatprep.subr.bf16.mxu0 %v700_v0 }
  0x74   :  { %528 = vmatpush3.bf16.msra.mxu0 %v570_v20 }
  0x75   :  { %529 = vmatprep.subr.bf16.mxu0 %v700_v0 }
  0x78   :  { %530 = vmatpush3.bf16.msra.mxu0 %v571_v21 }
  0x79   :  { %531 = vmatprep.subr.bf16.mxu0 %v700_v0 }
  0x7c   :  { %532 = vmatpush3.bf16.msra.mxu0 %v572_v22 }
  0x7d   :  { %533 = vmatprep.subr.bf16.mxu0 %v700_v0 }
  0x80   :  { %534 = vmatpush3.bf16.msra.mxu0 %v573_v23 }
  0x81   :  { %535 = vmatprep.subr.bf16.mxu0 %v700_v0 }
  0x84   :  { %536 = vmatpush3.bf16.msra.mxu0 %v574_v33 }
  0x85   :  { %537 = vmatprep.subr.bf16.mxu0 %v700_v0 }
  0x88   :  { %538 = vmatpush3.bf16.msra.mxu0 %v575_v34 }
 0x13e   :  { %v179_v25 = vpop.f32.mrb[0].mxu0 }
 0x13f   :  { %v180_v26 = vadd.f32 %v429_v24, %v179_v25  ;;  %v501_v27 = vpop.f32.mrb[1].mxu0 }
 0x140   :  { %v182_v28 = vpop.f32.mrb[2].mxu0 }
 0x141   :  { %vm185_vm1 = vcmp.ge.f32.partialorder %v180_v26, 0.0  ;;  %v186_v29 = vmul.f32 0.01, %v180_v26  ;;  %v502_v30 = vpop.f32.mrb[3].mxu0 }
 0x143   :  { %v187_v31 = vsel %vm185_vm1, %v180_v26, %v186_v29 }
 0x144   :  { %v188_v32 = vpack.c.bf16 %v187_v31, %v187_v31 }
 0x146   :  { %520 = vmatmul.mubr.bf16.vlgmr.msra.gmra.mrb[0].mxu1 %v188_v32 }
 0x219   :  { %v292_v36 = vpop.f32.mrb[0].mxu1 }
 0x21a   :  { %v293_v37 = vadd.f32 %v438_v35, %v292_v36  ;;  %v521_v38 = vpop.f32.mrb[1].mxu1 }
 0x21b   :  { %v295_v39 = vpop.f32.mrb[2].mxu1 }
 0x21c   :  { %vm298_vm2 = vcmp.ge.f32.partialorder %v293_v37, 0.0  ;;  %v299_v40 = vmul.f32 0.01, %v293_v37  ;;  %v522_v41 = vpop.f32.mrb[3].mxu1 }
 0x21e   :  { %v300_v42 = vsel %vm298_vm2, %v293_v37, %v299_v40 }
 0x21f   :  { %v301_v43 = vpack.c.bf16 %v300_v42, %v300_v42 }
 0x221   :  { %540 = vmatmul.mubr.bf16.vlgmr.msra.gmra.mrb[4].mxu0 %v301_v43 }
 0x2f4   :  { %v405_v45 = vpop.f32.mrb[4].mxu0 }
 0x2f5   :  { %v406_v46 = vadd.f32 %v447_v44, %v405_v45  ;;  %v541_v47 = vpop.f32.mrb[5].mxu0 }
 0x2f6   :  { %v408_v48 = vpop.f32.mrb[6].mxu0 }
 0x2f7   :  { %411 = vst [vmem:[#allocation10] sm:$0xff] %v406_v46  ;;  %v542_v49 = vpop.f32.mrb[7].mxu0 }
 0x2f8   :  { %675 = shalt.err (!%p672_p8)
}
 0x2f9   :  { %s676_s4 = scalar_lea.hbm %s846_s5, 128 }
 0x2fa   :  { %p677_p9 = scmp.ne.s32.totalorder %s846_s5, %s676_s4  ;;  %p680_p10 = scmp.lt.u32.totalorder %s676_s4, %s846_s5 }
 0x2fc   :  { %p682_p11 = pnand %p680_p10, %p677_p9 }
 0x2fe   :  { %685 = shalt.err (!%p682_p11)
}
 0x2ff   :  { %421 = dma.vmem_to_hbm [thread:$0]  %s419_s20, 128, %s846_s5, [#allocation4]  }
 0x300   :  { %692 = dma.done.wait [#allocation4], 128  }
 0x301   :  { %693 = vsyncadd [#allocation4], 4294967168 }
 0x302   :  { %425 = vsyncpa [#allocation3], 1 }
 0x303   :  { %426 = vsyncpa [#allocation6], 1 }
 0x304   :  { %427 = vsyncpa [#allocation9], 1 }
 0x305   :  { %428 = vsyncpa [#allocation4], 1 }

</bundles_post_ra>
